<compile_context>
chip_gen: v6e
topology: v6e:2x2x1
jax: 0.10.0
libtpu: 0.0.40
codegen_flags: <defaults>
</compile_context>

<pallas_src>
import functools

import jax
import jax.numpy as jnp
from jax import lax
from jax.experimental import pallas as pl
from jax.experimental.pallas import tpu as pltpu


_NEG_BIG = -1e30  # additive mask for padded class columns (finite -> no NaNs)


def _round_up(x, m):
    return ((x + m - 1) // m) * m


def _norm_softmax_kernel(emb_ref, w_ref, invn_ref, bias_ref, tgt_ref,
                         logits_ref, loss_ref,
                         m_ref, l_ref, p_ref, *,
                         inv_temperature, tile_n, picked_in_kernel):
    ni = pl.program_id(1)
    nn = pl.num_programs(1)

    # --- init online-softmax state at the first class tile ---
    @pl.when(ni == 0)
    def _():
        m_ref[...] = jnp.full_like(m_ref, -jnp.inf)
        l_ref[...] = jnp.zeros_like(l_ref)
        p_ref[...] = jnp.zeros_like(p_ref)

    # MXU: contract emb dim 1 with weight dim 1 (NT layout, f32 accumulation).
    raw = lax.dot_general(
        emb_ref[...], w_ref[...],
        dimension_numbers=(((1,), (1,)), ((), ())),
        preferred_element_type=jnp.float32)               # (TB, TN) f32

    # Precomputed per-class 1/||w|| (lane-dense (1, TN)) -> normalized logits.
    logits = raw * invn_ref[...]
    logits_ref[...] = logits.astype(logits_ref.dtype)

    # Temperature folded in as a constant multiply; additive padding bias
    # (0 for valid classes, -1e30 for padded columns).
    scaled = logits * inv_temperature + bias_ref[...]

    if picked_in_kernel:
        tb, tn = scaled.shape
        col = ni * tile_n + lax.broadcasted_iota(jnp.int32, (tb, tn), 1)
        p_ref[...] += jnp.sum(jnp.where(col == tgt_ref[...], scaled, 0.0),
                              axis=1, keepdims=True)

    # Online softmax statistics (running max / running sum).
    m_prev = m_ref[...]
    m_new = jnp.maximum(m_prev, jnp.max(scaled, axis=1, keepdims=True))
    alpha = jnp.exp(m_prev - m_new)
    l_ref[...] = alpha * l_ref[...] + jnp.sum(jnp.exp(scaled - m_new),
                                              axis=1, keepdims=True)
    m_ref[...] = m_new

    # --- finalize: per-row logsumexp (minus picked value if done in-kernel) ---
    @pl.when(ni == nn - 1)
    def _():
        lse = m_ref[...] + jnp.log(l_ref[...])
        if picked_in_kernel:
            loss_ref[...] = lse - p_ref[...]
        else:
            loss_ref[...] = lse      # wrapper subtracts the picked logit


def _vmem_bytes(tb, tn, d_pad, esize, wsize, osize):
    return (2 * tb * d_pad * esize        # embeddings tiles (double-buffered)
            + 2 * tn * d_pad * wsize      # weight tiles (streamed, double-buffered)
            + 2 * tb * tn * osize         # logits output tiles
            + 3 * tb * tn * 4             # f32 temporaries (raw / logits / scaled)
            + 4 * tn * 4 + 3 * tb * 4 + tb * 8   # aux rows, scratch, targets
            + (2 << 20))                  # slack


def norm_softmax_loss(embeddings, weight, targets, temperature=0.05,
                      block_b=512, block_n=512, use_bf16_matmul=False):
    """Pallas forward of NormSoftmaxLoss. Returns (logits, loss)."""
    B, D = embeddings.shape
    N, D2 = weight.shape
    assert D == D2

    out_dtype = embeddings.dtype
    esize = 2 if use_bf16_matmul else jnp.dtype(embeddings.dtype).itemsize
    wsize = 2 if use_bf16_matmul else jnp.dtype(weight.dtype).itemsize
    osize = jnp.dtype(out_dtype).itemsize

    # --- tile selection ----------------------------------------------------
    D_pad = _round_up(D, 128)                      # lane-dense contraction dim
    block_n = max(128, _round_up(block_n, 128))
    N_128 = _round_up(N, 128)
    TN = N_128 if N_128 <= block_n else block_n

    block_b = max(8, _round_up(block_b, 8))
    B8 = _round_up(B, 8)
    if B8 > block_b:
        TB = block_b
    elif B8 >= 16:
        TB = _round_up(B8 // 2, 8)                 # >= 2 batch tiles (v7x 2 TCs)
    else:
        TB = B8

    # VMEM budget: 75% of physical capacity (48 MiB fallback, safe on v7x).
    try:
        vmem_cap = int(pltpu.get_tpu_info().vmem_capacity_bytes)
    except Exception:
        vmem_cap = 64 * 1024 * 1024
    budget = int(vmem_cap * 0.75)
    # Note: for very large D (>= ~4K at f32) a K (contraction) grid axis with an
    # f32 accumulator would be preferable to shrinking TN/TB; not needed here.
    while TN > 256 and _vmem_bytes(TB, TN, D_pad, esize, wsize, osize) > budget:
        TN = max(256, _round_up(TN // 2, 128))
    while TB > 128 and _vmem_bytes(TB, TN, D_pad, esize, wsize, osize) > budget:
        TB = max(128, _round_up(TB // 2, 8))

    B_pad = _round_up(B8, TB)
    N_pad = _round_up(N_128, TN)

    est = _vmem_bytes(TB, TN, D_pad, esize, wsize, osize)
    vmem_limit = int(min(budget, max(32 * 1024 * 1024, est)))

    # --- precomputed per-class inverse L2 norm + padded-class bias ----------
    # 1 / max(||w||, 1e-12) == rsqrt(max(sum(w^2), 1e-24)); one O(N*D) XLA pass.
    w_f32 = weight.astype(jnp.float32)
    inv_norm = lax.rsqrt(jnp.maximum(jnp.sum(w_f32 * w_f32, axis=1), 1e-24))
    invn_row = jnp.pad(inv_norm[None, :], ((0, 0), (0, N_pad - N)))
    col_ids = jnp.arange(N_pad, dtype=jnp.int32)[None, :]
    bias_row = jnp.where(col_ids < N, 0.0, _NEG_BIG).astype(jnp.float32)

    # --- pad operands to tile-aligned shapes --------------------------------
    emb_p = embeddings.astype(jnp.bfloat16) if use_bf16_matmul else embeddings
    w_p = weight.astype(jnp.bfloat16) if use_bf16_matmul else weight
    emb_p = jnp.pad(emb_p, ((0, B_pad - B), (0, D_pad - D)))
    w_p = jnp.pad(w_p, ((0, N_pad - N), (0, D_pad - D)))
    tgt_p = jnp.pad(targets.reshape(B, 1).astype(jnp.int32),
                    ((0, B_pad - B), (0, 0)))

    # Keep the in-kernel f32 "picked" path only when logits lose precision.
    picked_in_kernel = jnp.dtype(out_dtype) != jnp.dtype(jnp.float32)
    inv_temperature = float(1.0 / temperature)

    kernel = functools.partial(
        _norm_softmax_kernel,
        inv_temperature=inv_temperature,
        tile_n=TN,
        picked_in_kernel=bool(picked_in_kernel))

    n_btiles = B_pad // TB
    cost = pl.CostEstimate(
        flops=2 * B_pad * N_pad * D_pad,
        transcendentals=B_pad * N_pad,
        bytes_accessed=int(B_pad * D_pad * esize
                           + n_btiles * N_pad * D_pad * wsize
                           + B_pad * N_pad * osize))

    logits_p, row_out = pl.pallas_call(
        kernel,
        out_shape=(
            jax.ShapeDtypeStruct((B_pad, N_pad), out_dtype),
            jax.ShapeDtypeStruct((B_pad, 1), jnp.float32),
        ),
        grid_spec=pltpu.PrefetchScalarGridSpec(
            num_scalar_prefetch=0,
            grid=(B_pad // TB, N_pad // TN),
            in_specs=[
                pl.BlockSpec((TB, D_pad), lambda bi, ni: (bi, 0)),   # embeddings
                pl.BlockSpec((TN, D_pad), lambda bi, ni: (ni, 0)),   # weight (streamed)
                pl.BlockSpec((1, TN), lambda bi, ni: (0, ni)),       # 1/||w|| row
                pl.BlockSpec((1, TN), lambda bi, ni: (0, ni)),       # pad bias row
                pl.BlockSpec((TB, 1), lambda bi, ni: (bi, 0)),       # targets
            ],
            out_specs=(
                pl.BlockSpec((TB, TN), lambda bi, ni: (bi, ni)),     # logits
                pl.BlockSpec((TB, 1), lambda bi, ni: (bi, 0)),       # per-row lse/loss
            ),
            scratch_shapes=[
                pltpu.VMEM((TB, 1), jnp.float32),   # running max
                pltpu.VMEM((TB, 1), jnp.float32),   # running sum
                pltpu.VMEM((TB, 1), jnp.float32),   # running picked
            ],
        ),
        compiler_params=pltpu.CompilerParams(
            dimension_semantics=("parallel", "arbitrary"),
            vmem_limit_bytes=vmem_limit),
        cost_estimate=cost,
    )(emb_p, w_p, invn_row, bias_row, tgt_p)

    logits = logits_p[:B, :N]
    if picked_in_kernel:
        loss = jnp.mean(row_out[:B, 0])
    else:
        picked = jnp.take_along_axis(
            logits.astype(jnp.float32),
            targets[:, None].astype(jnp.int32), axis=1)[:, 0]
        loss = jnp.mean(row_out[:B, 0] - picked * inv_temperature)
    return logits, loss


def norm_softmax_loss_ref(embeddings, weight, targets, temperature=0.05):
    """Pure-JAX reference for verification."""
    nw = weight / jnp.maximum(
        jnp.linalg.norm(weight, axis=1, keepdims=True), 1e-12)
    logits = embeddings @ nw.T
    scaled = logits / temperature
    lse = jax.scipy.special.logsumexp(scaled, axis=1)
    picked = jnp.take_along_axis(scaled, targets[:, None], axis=1)[:, 0]
    return logits, jnp.mean(lse - picked)


def _run_case(B, D, N, temperature, key, **kw):
    k_emb, k_w, k_tgt = jax.random.split(key, 3)
    embeddings = jax.random.normal(k_emb, (B, D), dtype=jnp.float32)
    stdv = 1.0 / (D ** 0.5)   # PyTorch init: uniform(-stdv, stdv)
    weight = jax.random.uniform(k_w, (N, D), dtype=jnp.float32,
                                minval=-stdv, maxval=stdv)
    targets = jax.random.randint(k_tgt, (B,), 0, N, dtype=jnp.int32)

    logits, loss = norm_softmax_loss(embeddings, weight, targets,
                                     temperature, **kw)
    jax.block_until_ready((logits, loss))

    logits_ref, loss_ref = norm_softmax_loss_ref(embeddings, weight, targets,
                                                 temperature)
    assert jnp.allclose(logits, logits_ref, atol=1e-4, rtol=1e-4)
    assert jnp.allclose(loss, loss_ref, atol=1e-4, rtol=1e-4)


if __name__ == "__main__":
    key = jax.random.PRNGKey(0)
    k1, k2 = jax.random.split(key)

    # Small deterministic problem: dim=32, num_instances=16, batch=8
    # (D padded to 128 lanes, classes padded/masked to 128).
    _run_case(B=8, D=32, N=16, temperature=0.05, key=k1)

    # Multi-tile / padded path: N=384 tiled in blocks of 256 (N_pad=512),
    # batch split into two 16-row tiles (B_pad=32).
    _run_case(B=20, D=128, N=384, temperature=0.05, key=k2, block_n=256)

    print("KERNEL_OK")
</pallas_src>

<mosaic_0001>
module attributes {stable_mosaic.version = 11 : i64} {
  func.func @_norm_softmax_kernel(%arg0: i32, %arg1: i32, %arg2: memref<8x128xf32, #tpu.memory_space<vmem>>, %arg3: memref<128x128xf32, #tpu.memory_space<vmem>>, %arg4: memref<1x128xf32, #tpu.memory_space<vmem>>, %arg5: memref<1x128xf32, #tpu.memory_space<vmem>>, %arg6: memref<8x1xi32, #tpu.memory_space<vmem>>, %arg7: memref<8x128xf32, #tpu.memory_space<vmem>>, %arg8: memref<8x1xf32, #tpu.memory_space<vmem>>, %arg9: memref<8x1xf32, #tpu.memory_space<vmem>>, %arg10: memref<8x1xf32, #tpu.memory_space<vmem>>, %arg11: memref<8x1xf32, #tpu.memory_space<vmem>>) attributes {dimension_semantics = [#tpu.dimension_semantics<parallel>, #tpu.dimension_semantics<arbitrary>], iteration_bounds = array<i64: 1, 1>, scalar_prefetch = 0 : i64, scratch_operands = 3 : i64, tpu.core_type = #tpu.core_type<tc>, window_params = [{transform_indices = @transform_0, window_bounds = array<i64: 8, 128>}, {transform_indices = @transform_1, window_bounds = array<i64: 128, 128>}, {transform_indices = @transform_2, window_bounds = array<i64: 1, 128>}, {transform_indices = @transform_3, window_bounds = array<i64: 1, 128>}, {transform_indices = @transform_4, window_bounds = array<i64: 8, 1>}, {transform_indices = @transform_5, window_bounds = array<i64: 8, 128>}, {transform_indices = @transform_6, window_bounds = array<i64: 8, 1>}]} {
    %c0_i32 = arith.constant 0 : i32
    %0 = arith.cmpi eq, %arg1, %c0_i32 : i32
    %1 = arith.extui %0 : i1 to i32
    %c0_i32_0 = arith.constant 0 : i32
    %2 = arith.cmpi ne, %1, %c0_i32_0 : i32
    scf.if %2 {
      %cst_23 = arith.constant 0xFF800000 : f32
      %34 = vector.broadcast %cst_23 : f32 to vector<8x1xf32>
      %c0_24 = arith.constant 0 : index
      %c0_25 = arith.constant 0 : index
      %35 = vector.load %arg9[%c0_24, %c0_25] : memref<8x1xf32, #tpu.memory_space<vmem>>, vector<8x1xf32>
      tpu.vector_store %arg9[%c0_24, %c0_25], %34 {strides = array<i32>} : memref<8x1xf32, #tpu.memory_space<vmem>>, vector<8x1xf32>,
      %cst_26 = arith.constant 0.000000e+00 : f32
      %36 = vector.broadcast %cst_26 : f32 to vector<8x1xf32>
      %c0_27 = arith.constant 0 : index
      %c0_28 = arith.constant 0 : index
      %37 = vector.load %arg10[%c0_27, %c0_28] : memref<8x1xf32, #tpu.memory_space<vmem>>, vector<8x1xf32>
      tpu.vector_store %arg10[%c0_27, %c0_28], %36 {strides = array<i32>} : memref<8x1xf32, #tpu.memory_space<vmem>>, vector<8x1xf32>,
      %cst_29 = arith.constant 0.000000e+00 : f32
      %38 = vector.broadcast %cst_29 : f32 to vector<8x1xf32>
      %c0_30 = arith.constant 0 : index
      %c0_31 = arith.constant 0 : index
      %39 = vector.load %arg11[%c0_30, %c0_31] : memref<8x1xf32, #tpu.memory_space<vmem>>, vector<8x1xf32>
      tpu.vector_store %arg11[%c0_30, %c0_31], %38 {strides = array<i32>} : memref<8x1xf32, #tpu.memory_space<vmem>>, vector<8x1xf32>,
    } else {
    }
    %c0 = arith.constant 0 : index
    %c0_1 = arith.constant 0 : index
    %3 = vector.load %arg2[%c0, %c0_1] : memref<8x128xf32, #tpu.memory_space<vmem>>, vector<8x128xf32>
    %c0_2 = arith.constant 0 : index
    %c0_3 = arith.constant 0 : index
    %4 = vector.load %arg3[%c0_2, %c0_3] : memref<128x128xf32, #tpu.memory_space<vmem>>, vector<128x128xf32>
    %cst = arith.constant dense<0.000000e+00> : vector<8x128xf32>
    %5 = tpu.matmul %3, %4, %cst {dimension_numbers = #tpu.dot_dimension_numbers<[1], [1], [0], [0], [0, 0, 1, 0], [], []>} : vector<8x128xf32>, vector<128x128xf32>, vector<8x128xf32> -> vector<8x128xf32>
    %c0_4 = arith.constant 0 : index
    %c0_5 = arith.constant 0 : index
    %6 = vector.load %arg4[%c0_4, %c0_5] : memref<1x128xf32, #tpu.memory_space<vmem>>, vector<1x128xf32>
    %7 = vector.broadcast %6 : vector<1x128xf32> to vector<8x128xf32>
    %8 = arith.mulf %5, %7 : vector<8x128xf32>
    %c0_6 = arith.constant 0 : index
    %c0_7 = arith.constant 0 : index
    %9 = vector.load %arg7[%c0_6, %c0_7] : memref<8x128xf32, #tpu.memory_space<vmem>>, vector<8x128xf32>
    tpu.vector_store %arg7[%c0_6, %c0_7], %8 {strides = array<i32>} : memref<8x128xf32, #tpu.memory_space<vmem>>, vector<8x128xf32>,
    %cst_8 = arith.constant 2.000000e+01 : f32
    %10 = vector.broadcast %cst_8 : f32 to vector<8x128xf32>
    %11 = arith.mulf %8, %10 : vector<8x128xf32>
    %c0_9 = arith.constant 0 : index
    %c0_10 = arith.constant 0 : index
    %12 = vector.load %arg5[%c0_9, %c0_10] : memref<1x128xf32, #tpu.memory_space<vmem>>, vector<1x128xf32>
    %13 = vector.broadcast %12 : vector<1x128xf32> to vector<8x128xf32>
    %14 = arith.addf %11, %13 : vector<8x128xf32>
    %c0_11 = arith.constant 0 : index
    %c0_12 = arith.constant 0 : index
    %15 = vector.load %arg9[%c0_11, %c0_12] : memref<8x1xf32, #tpu.memory_space<vmem>>, vector<8x1xf32>
    %cst_13 = arith.constant dense<0xFF800000> : vector<8xf32>
    %16 = vector.multi_reduction <maximumf>, %14, %cst_13 [1] : vector<8x128xf32> to vector<8xf32>
    %17 = vector.shape_cast %16 : vector<8xf32> to vector<8x1xf32>
    %18 = arith.maximumf %15, %17 : vector<8x1xf32>
    %19 = arith.subf %15, %18 : vector<8x1xf32>
    %20 = math.exp %19 : vector<8x1xf32>
    %c0_14 = arith.constant 0 : index
    %c0_15 = arith.constant 0 : index
    %21 = vector.load %arg10[%c0_14, %c0_15] : memref<8x1xf32, #tpu.memory_space<vmem>>, vector<8x1xf32>
    %22 = arith.mulf %20, %21 : vector<8x1xf32>
    %23 = vector.broadcast %18 : vector<8x1xf32> to vector<8x128xf32>
    %24 = arith.subf %14, %23 : vector<8x128xf32>
    %25 = math.exp %24 : vector<8x128xf32>
    %cst_16 = arith.constant dense<0.000000e+00> : vector<8xf32>
    %26 = vector.multi_reduction <add>, %25, %cst_16 [1] : vector<8x128xf32> to vector<8xf32>
    %27 = vector.shape_cast %26 : vector<8xf32> to vector<8x1xf32>
    %28 = arith.addf %22, %27 : vector<8x1xf32>
    %c0_17 = arith.constant 0 : index
    %c0_18 = arith.constant 0 : index
    %29 = vector.load %arg10[%c0_17, %c0_18] : memref<8x1xf32, #tpu.memory_space<vmem>>, vector<8x1xf32>
    tpu.vector_store %arg10[%c0_17, %c0_18], %28 {strides = array<i32>} : memref<8x1xf32, #tpu.memory_space<vmem>>, vector<8x1xf32>,
    %c0_19 = arith.constant 0 : index
    %c0_20 = arith.constant 0 : index
    %30 = vector.load %arg9[%c0_19, %c0_20] : memref<8x1xf32, #tpu.memory_space<vmem>>, vector<8x1xf32>
    tpu.vector_store %arg9[%c0_19, %c0_20], %18 {strides = array<i32>} : memref<8x1xf32, #tpu.memory_space<vmem>>, vector<8x1xf32>,
    %c0_i32_21 = arith.constant 0 : i32
    %31 = arith.cmpi eq, %arg1, %c0_i32_21 : i32
    %32 = arith.extui %31 : i1 to i32
    %c0_i32_22 = arith.constant 0 : i32
    %33 = arith.cmpi ne, %32, %c0_i32_22 : i32
    scf.if %33 {
      %c0_23 = arith.constant 0 : index
      %c0_24 = arith.constant 0 : index
      %34 = vector.load %arg9[%c0_23, %c0_24] : memref<8x1xf32, #tpu.memory_space<vmem>>, vector<8x1xf32>
      %c0_25 = arith.constant 0 : index
      %c0_26 = arith.constant 0 : index
      %35 = vector.load %arg10[%c0_25, %c0_26] : memref<8x1xf32, #tpu.memory_space<vmem>>, vector<8x1xf32>
      %36 = math.log %35 : vector<8x1xf32>
      %37 = arith.addf %34, %36 : vector<8x1xf32>
      %c0_27 = arith.constant 0 : index
      %c0_28 = arith.constant 0 : index
      %38 = vector.load %arg8[%c0_27, %c0_28] : memref<8x1xf32, #tpu.memory_space<vmem>>, vector<8x1xf32>
      tpu.vector_store %arg8[%c0_27, %c0_28], %37 {strides = array<i32>} : memref<8x1xf32, #tpu.memory_space<vmem>>, vector<8x1xf32>,
    } else {
    }
    return
  }
  func.func @transform_0(%arg0: i32, %arg1: i32) -> (i32, i32) {
    %c0_i32 = arith.constant 0 : i32
    %c0_i32_0 = arith.constant 0 : i32
    return %arg0, %c0_i32 : i32, i32
  }
  func.func @transform_1(%arg0: i32, %arg1: i32) -> (i32, i32) {
    %c0_i32 = arith.constant 0 : i32
    %c0_i32_0 = arith.constant 0 : i32
    return %arg1, %c0_i32 : i32, i32
  }
  func.func @transform_2(%arg0: i32, %arg1: i32) -> (i32, i32) {
    %c0_i32 = arith.constant 0 : i32
    %c0_i32_0 = arith.constant 0 : i32
    return %c0_i32, %arg1 : i32, i32
  }
  func.func @transform_3(%arg0: i32, %arg1: i32) -> (i32, i32) {
    %c0_i32 = arith.constant 0 : i32
    %c0_i32_0 = arith.constant 0 : i32
    return %c0_i32, %arg1 : i32, i32
  }
  func.func @transform_4(%arg0: i32, %arg1: i32) -> (i32, i32) {
    %c0_i32 = arith.constant 0 : i32
    %c0_i32_0 = arith.constant 0 : i32
    return %arg0, %c0_i32 : i32, i32
  }
  func.func @transform_5(%arg0: i32, %arg1: i32) -> (i32, i32) {
    %c0_i32 = arith.constant 0 : i32
    return %arg0, %arg1 : i32, i32
  }
  func.func @transform_6(%arg0: i32, %arg1: i32) -> (i32, i32) {
    %c0_i32 = arith.constant 0 : i32
    %c0_i32_0 = arith.constant 0 : i32
    return %arg0, %c0_i32 : i32, i32
  }
}

</mosaic_0001>

<bundles_post_ra>
// kernel: tpu_custom_call.1
= control target key start
LH: loop header
LB: loop body
LE: loop exit
PB: predicated region body
PF: predicated region fallthrough
CT: control target
= control target key end

     0   :  { %12 = vsyncpa [#allocation6], 0  ;;  %s380_s0 = inlined_call_operand.vmem [shape: f32[8,128], index: 0, kind: input, shape index: {}]   ;;  %s381_s1 = inlined_call_operand.hbm [shape: f32[128,128], index: 1, kind: input, shape index: {}]   ;;  %s382_s2 = inlined_call_operand.vmem [shape: f32[1,128], index: 2, kind: input, shape index: {}]   ;;  %s383_s3 = inlined_call_operand.vmem [shape: f32[1,128], index: 3, kind: input, shape index: {}]   ;;  %s384_s4 = inlined_call_operand.vmem [shape: s32[8,1], index: 4, kind: input, shape index: {}]   ;;  %s385_s5 = inlined_call_operand.hbm [shape: f32[8,128], index: 5, kind: output, shape index: {0}]   ;;  %s386_s6 = inlined_call_operand.vmem [shape: f32[8,1], index: 6, kind: output, shape index: {1}]  }
   0x1   :  { %13 = vsyncpa [#allocation7], 0  ;;  %s314_s21 = smov [#allocation5]  }
   0x2   :  { %s21_s22 = sshll.u32 %s314_s21, 4  ;;  %s22_s22 = int_to_ptr.vmem [resolvable:$true] %s21_s22 }
   0x3   :  { %s278_s23 = scalar_lea.vmem %s22_s22, 2048  ;;  %p283_p1 = scmp.lt.s32.totalorder %s22_s22, %s22_s22 }
   0x4   :  { %p279_p0 = scmp.ne.s32.totalorder %s22_s22, %s278_s23  ;;  %p284_p2 = scmp.lt.s32.totalorder %s278_s23, %s278_s23 }
   0x6   :  { %p285_p3 = por %p284_p2, %p283_p1 }
   0x8   :  { %p286_p4 = pnand %p285_p3, %p279_p0 }
   0xa   :  { %289 = shalt.err (!%p286_p4)
}
   0xb   :  { %s315_s24 = smov 128   ;;  %s316_s4 = smov 8  }
   0xc   :  { %27 = dma.hbm_to_vmem [thread:$0]  %s381_s1, 2048, %s22_s22, [#allocation6], %s315_s24, %s315_s24, %s316_s4  }
   0xd   :  { %310 = dma.done.wait [#allocation6], 2048  }
   0xe   :  { %311 = vsyncadd [#allocation6], 4294965248  ;;  %v317_v0 = vmov 0.0   ;;  %vm318_vm0 = vmmov 0   ;;  %v61_v1 = vld [vmem:[#allocation5 + $0x78] sm:$0xff]  ;;  %v60_v2 = vld [vmem:[#allocation5 + $0x70] sm:$0xff] }
   0xf   :  { %220 = vmatprep.subr.mxu0 %v317_v0  ;;  %252 = vmatprep.mubr.msk.f32.mxu0 %vm318_vm0, %v317_v0  ;;  %v59_v3 = vld [vmem:[#allocation5 + $0x68] sm:$0xff]  ;;  %v58_v4 = vld [vmem:[#allocation5 + $0x60] sm:$0xff]  ;;  %v57_v5 = vld [vmem:[#allocation5 + $0x58] sm:$0xff]  ;;  %vm41_vm1 = vcmask 7168   ;;  %v319_v18 = vmov -inf   ;;  %v320_v26 = vmov 0  }
  0x10   :  { %221 = vmatpush3.xpose.msra.mxu0 %v61_v1  ;;  %v56_v6 = vld [vmem:[#allocation5 + $0x50] sm:$0xff]  ;;  %v55_v7 = vld [vmem:[#allocation5 + $0x48] sm:$0xff]  ;;  %v54_v8 = vld [vmem:[#allocation5 + $0x40] sm:$0xff]  ;;  %42 = vst.msk [vmem:[#allocation2] sm:$0xff] %vm41_vm1, %v319_v18  ;;  %263 = vset.pattern.permute.xlu0 %v320_v26 }
  0x11   :  { %222 = vmatprep.subr.mxu0 %v317_v0  ;;  %v53_v9 = vld [vmem:[#allocation5 + $0x38] sm:$0xff]  ;;  %v52_v10 = vld [vmem:[#allocation5 + $0x30] sm:$0xff]  ;;  %v51_v11 = vld [vmem:[#allocation5 + $0x28] sm:$0xff]  ;;  %43 = vst.msk [vmem:[#allocation3] sm:$0xff] %vm41_vm1, %v317_v0 }
  0x12   :  { %v50_v12 = vld [vmem:[#allocation5 + $0x20] sm:$0xff]  ;;  %v49_v13 = vld [vmem:[#allocation5 + $0x18] sm:$0xff]  ;;  %v48_v14 = vld [vmem:[#allocation5 + $0x10] sm:$0xff] }
  0x13   :  { %v47_v15 = vld [vmem:[#allocation5 + $0x8] sm:$0xff]  ;;  %v46_v16 = vld [vmem:[#allocation5] sm:$0xff]  ;;  %v45_v17 = vld [vmem:[%s380_s0] sm:$0xff]  ;;  %s321_s0 = smov [#allocation8]  }
  0x14   :  { %223 = vmatpush3.xpose.msra.mxu0 %v60_v2  ;;  %v201_v19 = vld [vmem:[%s382_s2] ss:$0 sm:$0xff]  ;;  %s188_s2 = sshll.u32 %s321_s0, 4  ;;  %s189_s2 = int_to_ptr.vmem [resolvable:$true] %s188_s2 }
  0x15   :  { %224 = vmatprep.subr.mxu0 %v317_v0  ;;  %v202_v23 = vld [vmem:[%s383_s3] ss:$0 sm:$0xff]  ;;  %s290_s3 = scalar_lea.vmem %s189_s2, 128  ;;  %p295_p6 = scmp.lt.s32.totalorder %s189_s2, %s189_s2 }
  0x16   :  { %p291_p5 = scmp.ne.s32.totalorder %s189_s2, %s290_s3  ;;  %p296_p7 = scmp.lt.s32.totalorder %s290_s3, %s290_s3 }
  0x17   :  { %v150_v27 = vld [vmem:[#allocation2] sm:$0xff] }
  0x18   :  { %225 = vmatpush3.xpose.msra.mxu0 %v59_v3  ;;  %p297_p8 = por %p296_p7, %p295_p6 }
  0x19   :  { %226 = vmatprep.subr.mxu0 %v317_v0 }
  0x1a   :  { %p298_p9 = pnand %p297_p8, %p291_p5 }
  0x1c   :  { %227 = vmatpush3.xpose.msra.mxu0 %v58_v4 }
  0x1d   :  { %228 = vmatprep.subr.mxu0 %v317_v0 }
  0x20   :  { %229 = vmatpush3.xpose.msra.mxu0 %v57_v5 }
  0x21   :  { %230 = vmatprep.subr.mxu0 %v317_v0 }
  0x24   :  { %231 = vmatpush3.xpose.msra.mxu0 %v56_v6 }
  0x25   :  { %232 = vmatprep.subr.mxu0 %v317_v0 }
  0x28   :  { %233 = vmatpush3.xpose.msra.mxu0 %v55_v7 }
  0x29   :  { %234 = vmatprep.subr.mxu0 %v317_v0 }
  0x2c   :  { %235 = vmatpush3.xpose.msra.mxu0 %v54_v8 }
  0x2d   :  { %236 = vmatprep.subr.mxu0 %v317_v0 }
  0x30   :  { %237 = vmatpush3.xpose.msra.mxu0 %v53_v9 }
  0x31   :  { %238 = vmatprep.subr.mxu0 %v317_v0 }
  0x34   :  { %239 = vmatpush3.xpose.msra.mxu0 %v52_v10 }
  0x35   :  { %240 = vmatprep.subr.mxu0 %v317_v0 }
  0x38   :  { %241 = vmatpush3.xpose.msra.mxu0 %v51_v11 }
  0x39   :  { %242 = vmatprep.subr.mxu0 %v317_v0 }
  0x3c   :  { %243 = vmatpush3.xpose.msra.mxu0 %v50_v12 }
  0x3d   :  { %244 = vmatprep.subr.mxu0 %v317_v0 }
  0x40   :  { %245 = vmatpush3.xpose.msra.mxu0 %v49_v13 }
  0x41   :  { %246 = vmatprep.subr.mxu0 %v317_v0 }
  0x44   :  { %247 = vmatpush3.xpose.msra.mxu0 %v48_v14 }
  0x45   :  { %248 = vmatprep.subr.mxu0 %v317_v0 }
  0x48   :  { %249 = vmatpush3.xpose.msra.mxu0 %v47_v15 }
  0x49   :  { %250 = vmatprep.subr.mxu0 %v317_v0 }
  0x4c   :  { %251 = vmatpush3.xpose.msra.mxu0 %v46_v16 }
  0x4f   :  { %253 = vmatmul.mubr.f32.vlgmr.msra.gmra.mxu0 %v45_v17 }
 0x10f   :  { %v128_v20 = vpop.f32.mrf.mxu0 }
 0x110   :  { %v139_v21 = vmul.f32 %v201_v19, %v128_v20 }
 0x111   :  { %v254_v22 = vpop.f32.mrf.mxu0 }
 0x112   :  { %v141_v24 = vmul.f32 20.0, %v139_v21  ;;  %140 = vst [vmem:[#allocation8] sm:$0xff] %v139_v21 }
 0x114   :  { %v149_v25 = vadd.f32 %v202_v23, %v141_v24 }
 0x116   :  { %151 = vmax.xlane.f32.xlu0 %v149_v25 }
 0x19f   :  { %v152_v28 = vpop.xlane.xlu0 %151 }
 0x1a0   :  { %v153_v29 = vmax.f32 %v150_v27, %v152_v28 }
 0x1a2   :  { %v154_v30 = vsub.f32 %v150_v27, %v153_v29  ;;  %172 = vst.msk [vmem:[#allocation2] sm:$0xff] %vm41_vm1, %v153_v29  ;;  %161 = vperm.xlu0 %263, %v153_v29  }
 0x21d   :  { %v162_v31 = vpop.permute.xlu0 %161 }
 0x21e   :  { %v164_v32 = vsub.f32 %v149_v25, %v162_v31 }
 0x220   :  { %v165_v33 = vmul.f32 1.442695, %v164_v32 }
 0x222   :  { %264 = vpow2.f32 %v165_v33 }
 0x22f   :  { %v265_v34 = vpop.eup %264 }
 0x230   :  { %167 = vadd.xlane.f32.xlu1 %v265_v34 }
 0x231   :  { %301 = shalt.err (!%p298_p9)
}
 0x232   :  { %191 = dma.vmem_to_hbm [thread:$0]  %s189_s2, 128, %s385_s5, [#allocation7]   ;;  %v155_v35 = vmul.f32 1.442695, %v154_v30  ;;  %v157_v37 = vld [vmem:[#allocation3] sm:$0xff]  ;;  %v176_v44 = vld [vmem:[#allocation2] sm:$0xff] }
 0x234   :  { %266 = vpow2.f32 %v155_v35 }
 0x241   :  { %v267_v36 = vpop.eup %266 }
 0x242   :  { %v158_v38 = vmul.f32 %v267_v36, %v157_v37 }
 0x2b9   :  { %v168_v39 = vpop.xlane.xlu1 %167 }
 0x2ba   :  { %v169_v40 = vadd.f32 %v168_v39, %v158_v38 }
 0x2bc   :  { %171 = vst.msk [vmem:[#allocation3] sm:$0xff] %vm41_vm1, %v169_v40 }
 0x2c3   :  { %v177_v41 = vld [vmem:[#allocation3] sm:$0xff] }
 0x2c4   :  { %268 = vlog2.f32 %v177_v41 }
 0x2d1   :  { %v269_v42 = vpop.eup %268 }
 0x2d2   :  { %v179_v43 = vmul.f32 0.6931472, %v269_v42 }
 0x2d4   :  { %v180_v45 = vadd.f32 %v179_v43, %v176_v44 }
 0x2d6   :  { %181 = vst.msk [vmem:[%s386_s6] sm:$0xff] %vm41_vm1, %v180_v45 }
 0x2d7   :  { %312 = dma.done.wait [#allocation7], 128  }
 0x2d8   :  { %313 = vsyncadd [#allocation7], 4294967168 }
 0x2d9   :  { %199 = vsyncpa [#allocation6], 1 }
 0x2da   :  { %200 = vsyncpa [#allocation7], 1 }

</bundles_post_ra>
